<compile_context>
chip_gen: v7x
topology: tpu7x:2x2x1
jax: 0.10.0
libtpu: 0.0.40
codegen_flags: <defaults>
</compile_context>

<pallas_src>
import jax
import jax.numpy as jnp
from jax.experimental import pallas as pl
from jax.experimental.pallas import tpu as pltpu


DEFAULT_TB = 512                 # max batch tile; conservative for v7x's 64 MiB VMEM
PALLAS_MIN_ELEMS = 128 * 128     # below this many output elems, let XLA fuse it


def _cdiv(a, m):
    return (a + m - 1) // m


def _round_up(n, m):
    return _cdiv(n, m) * m


def _sublane(dtype):
    # f32 -> 8, bf16 -> 16, int8/fp8 -> 32
    return max(8, 32 // jnp.dtype(dtype).itemsize)


# ----------------------------------------------------------------------------
# Kernel: one batch tile of  o = x @ W + b   (MXU matmul, f32 accumulation)
# ----------------------------------------------------------------------------
def _mm_bias_kernel(x_ref, w_ref, b_ref, o_ref):
    acc = jnp.dot(x_ref[...], w_ref[...], preferred_element_type=jnp.float32)
    o_ref[...] = (acc + b_ref[...]).astype(o_ref.dtype)


def _mm_bias_pallas(x, w, b, tb, out_dtype):
    """x: (B_pad, d_in) compute dtype, w: (d_in, d_out) compute dtype, b: (1, d_out) f32."""
    b_pad, d_in = x.shape
    d_out = w.shape[1]
    grid = (b_pad // tb,)

    cbytes = jnp.dtype(x.dtype).itemsize
    obytes = jnp.dtype(out_dtype).itemsize

    # VMEM budget: double-buffered x/out, single-buffered W/b, plus slack.
    needed = (2 * tb * d_in * cbytes
              + d_in * d_out * cbytes
              + d_out * 4
              + 2 * tb * d_out * obytes)
    vmem_limit = int(min(max(needed * 3 // 2 + (4 << 20), 32 << 20), 64 << 20))

    cost = pl.CostEstimate(
        flops=2 * b_pad * d_in * d_out,
        transcendentals=0,
        bytes_accessed=(b_pad * d_in * cbytes + d_in * d_out * cbytes
                        + d_out * 4 + b_pad * d_out * obytes),
    )

    return pl.pallas_call(
        _mm_bias_kernel,
        out_shape=jax.ShapeDtypeStruct((b_pad, d_out), out_dtype),
        grid_spec=pltpu.PrefetchScalarGridSpec(
            num_scalar_prefetch=0,
            grid=grid,
            in_specs=[
                # x: streamed per batch tile (double-buffered by Pallas)
                pl.BlockSpec((tb, d_in), lambda i: (i, 0)),
                # W, b: constant index_map -> VMEM-resident; single-buffered to
                # halve their footprint (important on v7x's 64 MiB VMEM).
                pl.BlockSpec((d_in, d_out), lambda i: (0, 0),
                             pipeline_mode=pl.Buffered(1)),
                pl.BlockSpec((1, d_out), lambda i: (0, 0),
                             pipeline_mode=pl.Buffered(1)),
            ],
            out_specs=pl.BlockSpec((tb, d_out), lambda i: (i, 0)),
        ),
        compiler_params=pltpu.CompilerParams(
            # batch axis is independent -> megacore split on v7x
            dimension_semantics=("parallel",),
            vmem_limit_bytes=vmem_limit,
        ),
        cost_estimate=cost,
    )(x, w, b)


# ----------------------------------------------------------------------------
# Wrapper: the MechanisticModel equivalent
# ----------------------------------------------------------------------------
class MechanisticModelPallas:
    """Linear MM with affine X/Y normalizers folded into the weights.

    compute_dtype: MXU operand dtype (bf16 recommended on bandwidth-starved v5e;
                   accumulation and bias stay f32 regardless).
    out_dtype:     output dtype; defaults to compute_dtype (halves store traffic
                   for bf16 compute).
    """

    def __init__(self, w, b, x_mean, x_std, y_mean, y_std, use_norm=True,
                 compute_dtype=jnp.float32, out_dtype=None,
                 batch_tile=DEFAULT_TB, force_pallas=False):
        d_in, d_out = w.shape
        self.d_in, self.d_out = d_in, d_out
        self.use_norm = use_norm
        self.compute_dtype = compute_dtype
        self.out_dtype = compute_dtype if out_dtype is None else out_dtype
        self.batch_tile = batch_tile
        self.force_pallas = force_pallas

        w = jnp.asarray(w, jnp.float32)
        b = jnp.asarray(b, jnp.float32).reshape(1, d_out)
        self.x_mean = jnp.asarray(x_mean, jnp.float32).reshape(1, d_in)
        self.x_std = jnp.asarray(x_std, jnp.float32).reshape(1, d_in)
        self.y_mean = jnp.asarray(y_mean, jnp.float32).reshape(1, d_out)
        self.y_std = jnp.asarray(y_std, jnp.float32).reshape(1, d_out)

        # --- raw MM weights (forward path) -----------------------------------
        self.w_raw = w
        self.b_raw = b

        # --- normalizers folded into the weights (forward_n path), at f32 ----
        #   y_n = ((x_n*x_std + x_mean) @ W + b - y_mean) / y_std
        #       = x_n @ (diag(x_std) @ W / y_std) + (x_mean @ W + b - y_mean)/y_std
        self.w_norm = (self.x_std.reshape(d_in, 1) * w) / self.y_std
        self.b_norm = (self.x_mean @ w + b - self.y_mean) / self.y_std

        # --- cast ONCE to the MXU operand dtype (no feature-dim padding) ------
        self._w_raw_c = self.w_raw.astype(compute_dtype)
        self._w_norm_c = self.w_norm.astype(compute_dtype)
        self._b_raw_f32 = self.b_raw          # bias stays f32
        self._b_norm_f32 = self.b_norm

    # -- tile-size selection ---------------------------------------------------
    def _pick_tile(self, B):
        sub = _sublane(self.compute_dtype)
        n_tiles = max(1, _cdiv(B, self.batch_tile))
        if B >= 2 * sub:
            # guarantee >=2 grid steps so both v7x TensorCores get work
            n_tiles = max(n_tiles, 2)
        tb = _round_up(_cdiv(B, n_tiles), sub)
        b_pad = _round_up(B, tb)
        return tb, b_pad

    def _apply(self, x, w_c, b_f32, w_full, b_full):
        B = x.shape[0]
        # tiny-problem fallback: launch overhead > work, let XLA fuse it
        if (not self.force_pallas) and (B * self.d_out < PALLAS_MIN_ELEMS):
            return x.astype(jnp.float32) @ w_full + b_full

        tb, b_pad = self._pick_tile(B)

        # single cast directly to the operand dtype; pad only the batch dim,
        # and only when actually needed (feature dims are passed unpadded).
        x_c = x.astype(self.compute_dtype)
        if b_pad != B:
            x_c = jnp.pad(x_c, ((0, b_pad - B), (0, 0)))

        y = _mm_bias_pallas(x_c, w_c, b_f32, tb, self.out_dtype)
        return y[:B] if b_pad != B else y

    # -- public API (mirrors the torch module) ---------------------------------
    def __call__(self, x):
        if self.use_norm:
            return self.forward_n(x)
        return self.forward(x)

    def forward(self, x):
        return self._apply(x, self._w_raw_c, self._b_raw_f32,
                           self.w_raw, self.b_raw)

    def forward_n(self, x_n):
        return self._apply(x_n, self._w_norm_c, self._b_norm_f32,
                           self.w_norm, self.b_norm)

    def scale_pars(self, x_norm):
        # X_N.inverse(x_norm) — pure elementwise glue, plain JAX.
        return x_norm * self.x_std + self.x_mean


# ----------------------------------------------------------------------------
# Pure-JAX reference
# ----------------------------------------------------------------------------
def reference_forward_n(x_n, w, b, x_mean, x_std, y_mean, y_std):
    x = x_n * x_std + x_mean
    y = x @ w + b
    return (y - y_mean) / y_std


if __name__ == "__main__":
    B, D_IN, D_OUT = 8, 16, 32

    key = jax.random.PRNGKey(0)
    k_x, k_w, k_b, k_xm, k_xs, k_ym, k_ys, k_x2 = jax.random.split(key, 8)

    x_n = jax.random.normal(k_x, (B, D_IN), dtype=jnp.float32)
    w = jax.random.normal(k_w, (D_IN, D_OUT), dtype=jnp.float32) * 0.1
    b = jax.random.normal(k_b, (1, D_OUT), dtype=jnp.float32) * 0.1
    x_mean = jax.random.normal(k_xm, (1, D_IN), dtype=jnp.float32)
    x_std = jax.random.uniform(k_xs, (1, D_IN), dtype=jnp.float32,
                               minval=0.5, maxval=2.0)
    y_mean = jax.random.normal(k_ym, (1, D_OUT), dtype=jnp.float32)
    y_std = jax.random.uniform(k_ys, (1, D_OUT), dtype=jnp.float32,
                               minval=0.5, maxval=2.0)

    y_ref = reference_forward_n(x_n, w, b, x_mean, x_std, y_mean, y_std)

    # --- f32-operand Pallas path (forced so the kernel runs at toy size) -----
    model = MechanisticModelPallas(w, b, x_mean, x_std, y_mean, y_std,
                                   use_norm=True, force_pallas=True)
    y_n = model(x_n)
    jax.block_until_ready(y_n)
    assert y_n.shape == (B, D_OUT)
    # folding the normalizers changes FP rounding order slightly -> 1e-4 tol
    assert jnp.allclose(y_n, y_ref, atol=1e-4, rtol=1e-4)

    # use_norm=False path (raw MM)
    y_raw = model.forward(x_n)
    jax.block_until_ready(y_raw)
    assert jnp.allclose(y_raw, x_n @ w + b, atol=1e-4, rtol=1e-4)

    # --- ragged / multi-tile batch (exercises >=2 grid steps + batch pad) ----
    B2 = 600
    x2 = jax.random.normal(k_x2, (B2, D_IN), dtype=jnp.float32)
    y2 = model(x2)
    jax.block_until_ready(y2)
    y2_ref = reference_forward_n(x2, w, b, x_mean, x_std, y_mean, y_std)
    assert y2.shape == (B2, D_OUT)
    assert jnp.allclose(y2, y2_ref, atol=1e-4, rtol=1e-4)

    # --- bf16-operand variant (v6e / v7x MXU path; bf16 writeback), relaxed tol
    model_bf16 = MechanisticModelPallas(w, b, x_mean, x_std, y_mean, y_std,
                                        use_norm=True, force_pallas=True,
                                        compute_dtype=jnp.bfloat16)
    y_n_bf16 = model_bf16(x_n)
    jax.block_until_ready(y_n_bf16)
    assert y_n_bf16.shape == (B, D_OUT)
    assert jnp.allclose(y_n_bf16.astype(jnp.float32), y_ref, atol=2e-1, rtol=5e-2)

    # --- tiny-size XLA fallback path (threshold, no forced Pallas) -----------
    model_small = MechanisticModelPallas(w, b, x_mean, x_std, y_mean, y_std,
                                         use_norm=True)
    y_small = model_small(x_n)
    jax.block_until_ready(y_small)
    assert jnp.allclose(y_small, y_ref, atol=1e-4, rtol=1e-4)

    # scale_pars == X_N.inverse
    sp = model.scale_pars(x_n)
    jax.block_until_ready(sp)
    assert jnp.allclose(sp, x_n * x_std + x_mean, atol=1e-6)

    print("KERNEL_OK")
</pallas_src>

<mosaic_0001>
module attributes {stable_mosaic.version = 11 : i64} {
  func.func @_mm_bias_kernel(%arg0: i32, %arg1: memref<8x16xf32, #tpu.memory_space<vmem>>, %arg2: memref<16x32xf32, #tpu.memory_space<vmem>>, %arg3: memref<1x32xf32, #tpu.memory_space<vmem>>, %arg4: memref<8x32xf32, #tpu.memory_space<vmem>>) attributes {dimension_semantics = [#tpu.dimension_semantics<parallel>], iteration_bounds = array<i64: 1>, scalar_prefetch = 0 : i64, scratch_operands = 0 : i64, tpu.core_type = #tpu.core_type<tc>, window_params = [{transform_indices = @transform_0, window_bounds = array<i64: 8, 16>}, {pipeline_mode = #tpu.pipeline_mode<synchronous>, transform_indices = @transform_1, window_bounds = array<i64: 16, 32>}, {pipeline_mode = #tpu.pipeline_mode<synchronous>, transform_indices = @transform_2, window_bounds = array<i64: 1, 32>}, {transform_indices = @transform_3, window_bounds = array<i64: 8, 32>}]} {
    %c0 = arith.constant 0 : index
    %c0_0 = arith.constant 0 : index
    %0 = vector.load %arg1[%c0, %c0_0] : memref<8x16xf32, #tpu.memory_space<vmem>>, vector<8x16xf32>
    %c0_1 = arith.constant 0 : index
    %c0_2 = arith.constant 0 : index
    %1 = vector.load %arg2[%c0_1, %c0_2] : memref<16x32xf32, #tpu.memory_space<vmem>>, vector<16x32xf32>
    %cst = arith.constant dense<0.000000e+00> : vector<8x32xf32>
    %2 = tpu.matmul %0, %1, %cst {dimension_numbers = #tpu.dot_dimension_numbers<[1], [0], [0], [1], [0, 0, 1, 1], [], []>} : vector<8x16xf32>, vector<16x32xf32>, vector<8x32xf32> -> vector<8x32xf32>
    %c0_3 = arith.constant 0 : index
    %c0_4 = arith.constant 0 : index
    %3 = vector.load %arg3[%c0_3, %c0_4] : memref<1x32xf32, #tpu.memory_space<vmem>>, vector<1x32xf32>
    %4 = vector.broadcast %3 : vector<1x32xf32> to vector<8x32xf32>
    %5 = arith.addf %2, %4 : vector<8x32xf32>
    %c0_5 = arith.constant 0 : index
    %c0_6 = arith.constant 0 : index
    %6 = vector.load %arg4[%c0_5, %c0_6] : memref<8x32xf32, #tpu.memory_space<vmem>>, vector<8x32xf32>
    tpu.vector_store %arg4[%c0_5, %c0_6], %5 {strides = array<i32>} : memref<8x32xf32, #tpu.memory_space<vmem>>, vector<8x32xf32>,
    return
  }
  func.func @transform_0(%arg0: i32) -> (i32, i32) {
    %c0_i32 = arith.constant 0 : i32
    %c0_i32_0 = arith.constant 0 : i32
    return %arg0, %c0_i32 : i32, i32
  }
  func.func @transform_1(%arg0: i32) -> (i32, i32) {
    %c0_i32 = arith.constant 0 : i32
    %c0_i32_0 = arith.constant 0 : i32
    %c0_i32_1 = arith.constant 0 : i32
    return %c0_i32, %c0_i32_0 : i32, i32
  }
  func.func @transform_2(%arg0: i32) -> (i32, i32) {
    %c0_i32 = arith.constant 0 : i32
    %c0_i32_0 = arith.constant 0 : i32
    %c0_i32_1 = arith.constant 0 : i32
    return %c0_i32, %c0_i32_0 : i32, i32
  }
  func.func @transform_3(%arg0: i32) -> (i32, i32) {
    %c0_i32 = arith.constant 0 : i32
    %c0_i32_0 = arith.constant 0 : i32
    return %arg0, %c0_i32 : i32, i32
  }
}

</mosaic_0001>

<bundles_post_ra>
// kernel: tpu_custom_call.1
= control target key start
LH: loop header
LB: loop body
LE: loop exit
PB: predicated region body
PF: predicated region fallthrough
CT: control target
= control target key end

     0   :  { %8 = vsyncpa [#allocation3], 0  ;;  %s312_s0 = inlined_call_operand.hbm [shape: f32[8,16], index: 0, kind: input, shape index: {}]   ;;  %s313_s1 = inlined_call_operand.hbm [shape: f32[16,32], index: 1, kind: input, shape index: {}]   ;;  %s314_s2 = inlined_call_operand.vmem [shape: f32[1,32], index: 2, kind: input, shape index: {}]   ;;  %s315_s3 = inlined_call_operand.hbm [shape: f32[8,32], index: 3, kind: output, shape index: {}]  }
   0x1   :  { %9 = vsyncpa [#allocation6], 0 }
   0x2   :  { %10 = vsyncpa [#allocation4], 0  ;;  %s238_s12 = smov [#allocation2]   ;;  %s239_s14 = smov [#allocation5]  }
   0x3   :  { %s17_s13 = sshll.u32 %s238_s12, 4  ;;  %s26_s15 = sshll.u32 %s239_s14, 4  ;;  %s18_s13 = int_to_ptr.vmem [resolvable:$true] %s17_s13  ;;  %s266_s15 = int_to_ptr.vmem [resolvable:$true] %s26_s15 }
   0x4   :  { %s166_s18 = scalar_lea.hbm %s312_s0, 128 }
   0x5   :  { %p167_p0 = scmp.ne.s32.totalorder %s312_s0, %s166_s18  ;;  %p170_p1 = scmp.lt.u32.totalorder %s166_s18, %s312_s0 }
   0x7   :  { %p172_p2 = pnand %p170_p1, %p167_p0 }
   0x9   :  { %175 = shalt.err (!%p172_p2)
}
   0xa   :  { %s176_s23 = scalar_lea.vmem %s18_s13, 128  ;;  %p181_p4 = scmp.lt.s32.totalorder %s18_s13, %s18_s13 }
   0xb   :  { %p177_p3 = scmp.ne.s32.totalorder %s18_s13, %s176_s23  ;;  %p182_p5 = scmp.lt.s32.totalorder %s176_s23, %s176_s23 }
   0xd   :  { %p183_p6 = por %p182_p5, %p181_p4 }
   0xf   :  { %p184_p7 = pnand %p183_p6, %p177_p3 }
  0x11   :  { %187 = shalt.err (!%p184_p7)
}
  0x12   :  { %20 = dma.hbm_to_vmem [thread:$0]  %s312_s0, 128, %s18_s13, [#allocation3]  }
  0x13   :  { %s188_s28 = scalar_lea.hbm %s313_s1, 256 }
  0x14   :  { %p189_p8 = scmp.ne.s32.totalorder %s313_s1, %s188_s28  ;;  %p192_p9 = scmp.lt.u32.totalorder %s188_s28, %s313_s1 }
  0x16   :  { %p194_p10 = pnand %p192_p9, %p189_p8 }
  0x18   :  { %197 = shalt.err (!%p194_p10)
}
  0x19   :  { %s198_s6 = scalar_lea.vmem %s266_s15, 256  ;;  %p203_p12 = scmp.lt.s32.totalorder %s266_s15, %s266_s15 }
  0x1a   :  { %p199_p11 = scmp.ne.s32.totalorder %s266_s15, %s198_s6  ;;  %p204_p13 = scmp.lt.s32.totalorder %s198_s6, %s198_s6 }
  0x1c   :  { %p205_p0 = por %p204_p13, %p203_p12 }
  0x1e   :  { %p206_p1 = pnand %p205_p0, %p199_p11 }
  0x20   :  { %209 = shalt.err (!%p206_p1)
}
  0x21   :  { %s240_s0 = smov 128   ;;  %s241_s7 = smov 8  }
  0x22   :  { %32 = dma.hbm_to_vmem [thread:$0]  %s313_s1, 256, %s266_s15, [#allocation6], %s240_s0, %s240_s0, %s241_s7  }
  0x23   :  { %232 = dma.done.wait [#allocation3], 128  }
  0x24   :  { %233 = vsyncadd [#allocation3], 4294967168 }
  0x25   :  { %234 = dma.done.wait [#allocation6], 256  }
  0x26   :  { %235 = vsyncadd [#allocation6], 4294967040  ;;  %v242_v0 = vmov 0.0|0.0   ;;  %vm243_vm0 = vmmov 0   ;;  %v244_v1 = vmov 0.0   ;;  %v42_v2 = vld [vmem:[#allocation5] sm:$0xff] }
  0x27   :  { %155 = vmatprep.subr.bf16.mxu0 %v242_v0  ;;  %152 = vmatprep.mubr.msk.f32.mxu0 %vm243_vm0, %v244_v1  ;;  %v43_v3 = vld [vmem:[#allocation5 + $0x8] sm:$0xff]  ;;  %v41_v5 = vld [vmem:[#allocation2] sm:$0xff]  ;;  %vm51_vm1 = vcmask 130048   ;;  %s245_s1 = smov [#allocation7]   ;;  %vm125_vm2 = vcmask 261120  }
  0x28   :  { %v156_v4 = vpack.c.bf16 %v43_v3, %v42_v2  ;;  %v143_v6 = vld [vmem:[%s314_s2] ss:$0 sm:$0xff]  ;;  %s133_s12 = sshll.u32 %s245_s1, 4  ;;  %s134_s12 = int_to_ptr.vmem [resolvable:$true] %s133_s12 }
  0x29   :  { %s210_s13 = scalar_lea.vmem %s134_s12, 128  ;;  %p215_p3 = scmp.lt.s32.totalorder %s134_s12, %s134_s12 }
  0x2a   :  { %157 = vmatpush3.bf16.msra.mxu0 %v156_v4  ;;  %p211_p2 = scmp.ne.s32.totalorder %s134_s12, %s210_s13  ;;  %p216_p4 = scmp.lt.s32.totalorder %s210_s13, %s210_s13 }
  0x2c   :  { %p217_p5 = por %p216_p4, %p215_p3 }
  0x2d   :  { %153 = vmatmul.mubr.msk.f32.vlgmr.msra.gmra.mrb[0].mxu0 %vm51_vm1, %v41_v5 }
  0x2e   :  { %p218_p6 = pnand %p217_p5, %p211_p2 }
 0x100   :  { %v121_v7 = vpop.f32.mrb[0].mxu0 }
 0x101   :  { %v122_v8 = vadd.f32 %v143_v6, %v121_v7  ;;  %v154_v9 = vpop.f32.mrb[1].mxu0 }
 0x103   :  { %126 = vst.msk [vmem:[#allocation7] sm:$0xff] %vm125_vm2, %v122_v8 }
 0x104   :  { %221 = shalt.err (!%p218_p6)
}
 0x105   :  { %s222_s16 = scalar_lea.hbm %s315_s3, 128 }
 0x106   :  { %p223_p7 = scmp.ne.s32.totalorder %s315_s3, %s222_s16  ;;  %p226_p8 = scmp.lt.u32.totalorder %s222_s16, %s315_s3 }
 0x108   :  { %p228_p9 = pnand %p226_p8, %p223_p7 }
 0x10a   :  { %231 = shalt.err (!%p228_p9)
}
 0x10b   :  { %136 = dma.vmem_to_hbm [thread:$0]  %s134_s12, 128, %s315_s3, [#allocation4]  }
 0x10c   :  { %236 = dma.done.wait [#allocation4], 128  }
 0x10d   :  { %237 = vsyncadd [#allocation4], 4294967168 }
 0x10e   :  { %140 = vsyncpa [#allocation3], 1 }
 0x10f   :  { %141 = vsyncpa [#allocation6], 1 }
 0x110   :  { %142 = vsyncpa [#allocation4], 1 }

</bundles_post_ra>
